<compile_context>
chip_gen: v5e
topology: v5e:2x2
jax: 0.10.0
libtpu: 0.0.40
codegen_flags: <defaults>
</compile_context>

<pallas_src>
import jax
import jax.numpy as jnp
from jax.experimental import pallas as pl
from jax.experimental.pallas import tpu as pltpu


def _round_up(x, m):
    return ((x + m - 1) // m) * m


def _critic_dense_kernel(x_ref, w_ref, b_ref, o_ref):
    # x: (tb, K), w: (K, N_pad), b: (1, N_pad) f32, o: (tb, N_pad) f32
    y = jnp.dot(x_ref[...], w_ref[...], preferred_element_type=jnp.float32)
    y = y + b_ref[...]
    o_ref[...] = jnp.maximum(y, 0.0).astype(o_ref.dtype)


def dense_relu_pallas(x, w_pad, b_pad, n_out, *, tile_b=1024,
                      compute_dtype=jnp.float32, min_split_rows=256):
    """ReLU(x @ w_pad + b_pad)[:, :n_out] with a batch-tiled, lane-dense kernel.

    x      : (B, K) activations (state ++ image_features, replication folded)
    w_pad  : (K, N_pad) weights, N_pad a multiple of 128 (zero-padded columns)
    b_pad  : (1, N_pad) float32 bias (zero-padded columns)
    """
    B, K = x.shape
    Kw, N_pad = w_pad.shape
    assert Kw == K
    assert N_pad % 128 == 0 and b_pad.shape == (1, N_pad)
    assert 0 < n_out <= N_pad

    is_bf16 = jnp.dtype(compute_dtype) == jnp.dtype(jnp.bfloat16)
    min_sublane = 16 if is_bf16 else 8

    # --- batch tile selection ---------------------------------------------
    b_ceil = _round_up(B, min_sublane)
    if b_ceil > tile_b:
        tb = tile_b
    elif b_ceil >= min_split_rows:
        # Enough work to split into >=2 grid steps so v7x's 2 TensorCores
        # both get a tile under dimension_semantics=("parallel",).
        tb = _round_up((b_ceil + 1) // 2, min_sublane)
    else:
        tb = b_ceil
    b_total = _round_up(B, tb)
    grid = (b_total // tb,)

    # --- dtype / padding prep ----------------------------------------------
    x_c = x.astype(compute_dtype)
    w_c = w_pad.astype(compute_dtype)
    if b_total != B:
        # Padded rows compute ReLU(0 @ W + b) = ReLU(b); sliced off below.
        x_c = jnp.pad(x_c, ((0, b_total - B), (0, 0)))

    act_itemsize = jnp.dtype(compute_dtype).itemsize
    cost = pl.CostEstimate(
        flops=2 * b_total * K * N_pad,
        transcendentals=0,
        bytes_accessed=(b_total * K + K * N_pad) * act_itemsize
                       + (N_pad + b_total * N_pad) * 4,
    )

    out = pl.pallas_call(
        _critic_dense_kernel,
        out_shape=jax.ShapeDtypeStruct((b_total, N_pad), jnp.float32),
        grid=grid,
        in_specs=[
            pl.BlockSpec((tb, K), lambda i: (i, 0)),     # activation tile (pipelined)
            pl.BlockSpec((K, N_pad), lambda i: (0, 0)),  # merged weights (VMEM-resident)
            pl.BlockSpec((1, N_pad), lambda i: (0, 0)),  # bias (VMEM-resident)
        ],
        out_specs=pl.BlockSpec((tb, N_pad), lambda i: (i, 0)),  # lane-dense output
        compiler_params=pltpu.CompilerParams(
            dimension_semantics=("parallel",),
        ),
        cost_estimate=cost,
    )(x_c, w_c, b_pad)

    return out[:B, :n_out]


class CriticPallas:
    """JAX/Pallas re-implementation of the PyTorch Critic forward pass."""

    def __init__(self, state_dim, emb_size, key):
        self.state_dim = state_dim
        self.emb_size = emb_size
        k_w, k_b = jax.random.split(key)
        # Deterministic init mimicking nn.Linear's uniform(-1/sqrt(in), 1/sqrt(in)).
        bound = 1.0 / jnp.sqrt(jnp.float32(state_dim))
        # PyTorch Linear stores W as (out, in); we keep (in, out) so the kernel
        # computes x @ W directly (same math as x @ W_pt^T).
        self.w = jax.random.uniform(
            k_w, (state_dim, emb_size), jnp.float32, -bound, bound
        )
        self.b = jax.random.uniform(
            k_b, (emb_size,), jnp.float32, -bound, bound
        )

    def _merged_params(self, s_feat):
        """Fold the 3x state replication into the weights and pad columns to 128.

        cat((state, state, state, image), -1) @ W
            == state @ (W[0:S] + W[S:2S] + W[2S:3S]) + image @ W[3S:]
        Recomputed from self.w each call (cheap; avoids stale-cache hazards).
        """
        S = s_feat
        w = self.w
        ws = w[0:S] + w[S:2 * S] + w[2 * S:3 * S]          # (S, N)
        wf = w[3 * S:]                                      # (F, N)
        w_merged = jnp.concatenate((ws, wf), axis=0)        # (S+F, N)
        n_pad = _round_up(self.emb_size, 128)
        pad_cols = n_pad - self.emb_size
        if pad_cols:
            w_merged = jnp.pad(w_merged, ((0, 0), (0, pad_cols)))
            b_pad = jnp.pad(self.b, ((0, pad_cols),))
        else:
            b_pad = self.b
        return w_merged, b_pad.reshape(1, n_pad)

    def forward(self, image_features, state, *, use_pallas=None,
                compute_dtype=jnp.float32):
        assert state.ndim == 2 and image_features.ndim == 2
        s_feat = state.shape[-1]
        f_feat = image_features.shape[-1]
        assert 3 * s_feat + f_feat == self.state_dim, (
            s_feat, f_feat, self.state_dim
        )
        B = state.shape[0]
        if use_pallas is None:
            # Small batches: a single fused XLA GEMM+ReLU beats the pallas_call
            # launch / pipeline-priming overhead.
            use_pallas = B >= 1024

        if not use_pallas:
            x_full = jnp.concatenate((state, state, state, image_features), -1)
            return jnp.maximum(x_full @ self.w + self.b, 0.0)

        w_merged, b_pad = self._merged_params(s_feat)
        x = jnp.concatenate((state, image_features), -1)    # (B, S+F)
        return dense_relu_pallas(x, w_merged, b_pad, self.emb_size,
                                 compute_dtype=compute_dtype)


if __name__ == "__main__":
    key = jax.random.PRNGKey(0)
    k_param, k_state, k_img = jax.random.split(key, 3)

    # Small shapes consistent with the forward pass:
    batch = 2
    s_feat = 8          # per-copy state feature dim
    img_feat = 8        # image-feature dim
    state_dim = 3 * s_feat + img_feat   # = 32, what nn.Linear(state_dim, ...) sees
    emb_size = 32

    critic = CriticPallas(state_dim, emb_size, k_param)

    state = jax.random.normal(k_state, (batch, s_feat), jnp.float32)
    image_features = jax.random.normal(k_img, (batch, img_feat), jnp.float32)

    # Force the Pallas path so the kernel itself runs at the demo shape.
    value = critic.forward(image_features, state, use_pallas=True)
    value = jax.block_until_ready(value)

    # Pure-JAX reference (original concatenated PyTorch formulation).
    ref = jnp.maximum(
        jnp.concatenate((state, state, state, image_features), -1) @ critic.w
        + critic.b,
        0.0,
    )
    assert value.shape == (batch, emb_size)
    assert jnp.allclose(value, ref, atol=1e-5), "pallas f32 mismatch vs reference"

    # Auto-dispatch path at tiny batch uses the fused XLA GEMM; must match too.
    value_auto = jax.block_until_ready(critic.forward(image_features, state))
    assert jnp.allclose(value_auto, ref, atol=1e-6), "xla path mismatch"

    # Larger batch: exercises row padding, the >=2-step grid split and bf16.
    B2 = 300
    k_s2, k_i2 = jax.random.split(jax.random.PRNGKey(1))
    state2 = jax.random.normal(k_s2, (B2, s_feat), jnp.float32)
    img2 = jax.random.normal(k_i2, (B2, img_feat), jnp.float32)
    ref2 = jnp.maximum(
        jnp.concatenate((state2, state2, state2, img2), -1) @ critic.w
        + critic.b,
        0.0,
    )
    val2 = jax.block_until_ready(critic.forward(img2, state2, use_pallas=True))
    assert val2.shape == (B2, emb_size)
    assert jnp.allclose(val2, ref2, atol=1e-5), "pallas f32 (large B) mismatch"

    val2_bf16 = jax.block_until_ready(
        critic.forward(img2, state2, use_pallas=True, compute_dtype=jnp.bfloat16)
    )
    assert jnp.allclose(val2_bf16, ref2, atol=3e-2, rtol=3e-2), "bf16 path mismatch"

    print("KERNEL_OK")
</pallas_src>

<mosaic_0001>
module attributes {stable_mosaic.version = 11 : i64} {
  func.func @_critic_dense_kernel(%arg0: i32, %arg1: memref<8x16xf32, #tpu.memory_space<vmem>>, %arg2: memref<16x128xf32, #tpu.memory_space<vmem>>, %arg3: memref<1x128xf32, #tpu.memory_space<vmem>>, %arg4: memref<8x128xf32, #tpu.memory_space<vmem>>) attributes {dimension_semantics = [#tpu.dimension_semantics<parallel>], iteration_bounds = array<i64: 1>, scalar_prefetch = 0 : i64, scratch_operands = 0 : i64, tpu.core_type = #tpu.core_type<tc>, window_params = [{transform_indices = @transform_0, window_bounds = array<i64: 8, 16>}, {pipeline_mode = #tpu.pipeline_mode<synchronous>, transform_indices = @transform_1, window_bounds = array<i64: 16, 128>}, {pipeline_mode = #tpu.pipeline_mode<synchronous>, transform_indices = @transform_2, window_bounds = array<i64: 1, 128>}, {transform_indices = @transform_3, window_bounds = array<i64: 8, 128>}]} {
    %c0 = arith.constant 0 : index
    %c0_0 = arith.constant 0 : index
    %0 = vector.load %arg1[%c0, %c0_0] : memref<8x16xf32, #tpu.memory_space<vmem>>, vector<8x16xf32>
    %c0_1 = arith.constant 0 : index
    %c0_2 = arith.constant 0 : index
    %1 = vector.load %arg2[%c0_1, %c0_2] : memref<16x128xf32, #tpu.memory_space<vmem>>, vector<16x128xf32>
    %cst = arith.constant dense<0.000000e+00> : vector<8x128xf32>
    %2 = tpu.matmul %0, %1, %cst {dimension_numbers = #tpu.dot_dimension_numbers<[1], [0], [0], [1], [0, 0, 1, 1], [], []>} : vector<8x16xf32>, vector<16x128xf32>, vector<8x128xf32> -> vector<8x128xf32>
    %c0_3 = arith.constant 0 : index
    %c0_4 = arith.constant 0 : index
    %3 = vector.load %arg3[%c0_3, %c0_4] : memref<1x128xf32, #tpu.memory_space<vmem>>, vector<1x128xf32>
    %4 = vector.broadcast %3 : vector<1x128xf32> to vector<8x128xf32>
    %5 = arith.addf %2, %4 : vector<8x128xf32>
    %cst_5 = arith.constant 0.000000e+00 : f32
    %6 = vector.broadcast %cst_5 : f32 to vector<8x128xf32>
    %7 = arith.maximumf %5, %6 : vector<8x128xf32>
    %c0_6 = arith.constant 0 : index
    %c0_7 = arith.constant 0 : index
    %8 = vector.load %arg4[%c0_6, %c0_7] : memref<8x128xf32, #tpu.memory_space<vmem>>, vector<8x128xf32>
    tpu.vector_store %arg4[%c0_6, %c0_7], %7 {strides = array<i32>} : memref<8x128xf32, #tpu.memory_space<vmem>>, vector<8x128xf32>,
    return
  }
  func.func @transform_0(%arg0: i32) -> (i32, i32) {
    %c0_i32 = arith.constant 0 : i32
    %c0_i32_0 = arith.constant 0 : i32
    return %arg0, %c0_i32 : i32, i32
  }
  func.func @transform_1(%arg0: i32) -> (i32, i32) {
    %c0_i32 = arith.constant 0 : i32
    %c0_i32_0 = arith.constant 0 : i32
    %c0_i32_1 = arith.constant 0 : i32
    return %c0_i32, %c0_i32_0 : i32, i32
  }
  func.func @transform_2(%arg0: i32) -> (i32, i32) {
    %c0_i32 = arith.constant 0 : i32
    %c0_i32_0 = arith.constant 0 : i32
    %c0_i32_1 = arith.constant 0 : i32
    return %c0_i32, %c0_i32_0 : i32, i32
  }
  func.func @transform_3(%arg0: i32) -> (i32, i32) {
    %c0_i32 = arith.constant 0 : i32
    %c0_i32_0 = arith.constant 0 : i32
    return %arg0, %c0_i32 : i32, i32
  }
}

</mosaic_0001>

<bundles_post_ra>
// kernel: tpu_custom_call.1
= control target key start
LH: loop header
LB: loop body
LE: loop exit
PB: predicated region body
PF: predicated region fallthrough
CT: control target
= control target key end

     0   :  { %8 = vsyncpa [#allocation3], 0  ;;  %s218_s0 = inlined_call_operand.hbm [shape: f32[8,16], index: 0, kind: input, shape index: {}]   ;;  %s219_s1 = inlined_call_operand.hbm [shape: f32[16,128], index: 1, kind: input, shape index: {}]   ;;  %s220_s2 = inlined_call_operand.vmem [shape: f32[1,128], index: 2, kind: input, shape index: {}]   ;;  %s221_s3 = inlined_call_operand.hbm [shape: f32[8,128], index: 3, kind: output, shape index: {}]  }
   0x1   :  { %9 = vsyncpa [#allocation6], 0 }
   0x2   :  { %10 = vsyncpa [#allocation4], 0  ;;  %s16_s14 = sshll.u32 %s218_s0, 4  ;;  %s181_s15 = smov [#allocation2]   ;;  %s17_s14 = int_to_ptr.hbm [resolvable:$true] %s16_s14 }
   0x3   :  { %s18_s16 = sshll.u32 %s181_s15, 4  ;;  %s26_s19 = sshll.u32 %s219_s1, 4  ;;  %s19_s16 = int_to_ptr.vmem [resolvable:$true] %s18_s16  ;;  %s27_s19 = int_to_ptr.hbm [resolvable:$true] %s26_s19 }
   0x4   :  { %21 = dma.hbm_to_vmem [thread:$0]  %s17_s14, 128, %s19_s16, [#allocation3]  }
   0x5   :  { %s182_s20 = smov [#allocation5]   ;;  %s183_s22 = smov 128  }
   0x6   :  { %s28_s21 = sshll.u32 %s182_s20, 4  ;;  %s184_s23 = smov 8   ;;  %s29_s21 = int_to_ptr.vmem [resolvable:$true] %s28_s21 }
   0x7   :  { %34 = dma.hbm_to_vmem [thread:$0]  %s27_s19, 256, %s29_s21, [#allocation6], %s183_s22, %s183_s22, %s184_s23  }
   0x8   :  { %175 = dma.done.wait [#allocation3], 128  }
   0x9   :  { %176 = vsyncadd [#allocation3], 4294967168 }
   0xa   :  { %177 = dma.done.wait [#allocation6], 256  }
   0xb   :  { %178 = vsyncadd [#allocation6], 4294967040  ;;  %v47_v0 = vld [vmem:[#allocation5 + $0x8] sm:$0xff]  ;;  %v46_v1 = vld [vmem:[#allocation5] sm:$0xff]  ;;  %vm52_vm0 = vcmask 130048   ;;  %s185_s24 = smov [#allocation7]  }
   0xc   :  { %70 = vmatpush.msra.mxu0 %v47_v0  ;;  %v45_v2 = vld [vmem:[#allocation2] sm:$0xff]  ;;  %s83_s25 = sshll.u32 %s185_s24, 4  ;;  %s85_s28 = sshll.u32 %s221_s3, 4  ;;  %s84_s25 = int_to_ptr.vmem [resolvable:$true] %s83_s25  ;;  %s86_s28 = int_to_ptr.hbm [resolvable:$true] %s85_s28 }
   0xd   :  { %v102_v3 = vld [vmem:[%s220_s2] ss:$0 sm:$0xff] }
   0xe   :  { %71 = vmatpush.msra.mxu0 %v46_v1 }
   0xf   :  { %96 = vmatmul.msk.f32.vlgmr.msra.gmra.mxu0 %vm52_vm0, %v45_v2 }
  0x8c   :  { %v73_v4 = vpop.f32.mrf.mxu0 }
  0x8d   :  { %v74_v5 = vadd.f32 %v102_v3, %v73_v4 }
  0x8f   :  { %v76_v6 = vmax.f32 %v74_v5, 0.0 }
  0x91   :  { %77 = vst [vmem:[#allocation7] sm:$0xff] %v76_v6 }
  0x92   :  { %88 = dma.vmem_to_hbm [thread:$0]  %s84_s25, 128, %s86_s28, [#allocation4]  }
  0x93   :  { %179 = dma.done.wait [#allocation4], 128  }
  0x94   :  { %180 = vsyncadd [#allocation4], 4294967168 }
  0x95   :  { %93 = vsyncpa [#allocation3], 1 }
  0x96   :  { %94 = vsyncpa [#allocation6], 1 }
  0x97   :  { %95 = vsyncpa [#allocation4], 1 }

</bundles_post_ra>
